<compile_context>
chip_gen: v7x
topology: tpu7x:2x2x1
jax: 0.10.0
libtpu: 0.0.40
codegen_flags: <defaults>
</compile_context>

<pallas_src>
import jax
import jax.numpy as jnp
from jax.experimental import pallas as pl
from jax.experimental.pallas import tpu as pltpu


def _cat_kernel(ew_ref, x_ref, y_ref, o_ref):
    """One grid step: one batch element x one block of TH input rows.

    All spatial data is in the row-merged layout (H, 4W): output row i holds
    the two duplicated output rows of the 2x-upsample concatenated along the
    lane dim, so the upsample is a single lane-dense MXU matmul.

    ew_ref: (W, 4W)        0/1 dup matrix, EW[w, q] = ((q % 2W) // 2 == w)
    x_ref : (Cx, TH, W)
    y_ref : (Cy, TH, 4W)   y viewed as (N, Cy, H, 4W)
    o_ref : (Cx+Cy, TH, 4W)
    """
    cx, th, w = x_ref.shape
    # Fold channels into rows (free relayout when TH % 8 == 0) so the upsample
    # is one 2-D MXU matmul instead of Cx small batched matmuls.  The 0/1
    # matmul into an f32 accumulator is exact (each output is a plain copy).
    x2d = x_ref[...].reshape(cx * th, w)
    up = jnp.dot(x2d, ew_ref[...], preferred_element_type=jnp.float32)

    # Channel concat via two direct sub-slice stores on the (untiled) leading
    # channel dim; both stores are full, lane-dense (trailing dim 4W) tiles.
    o_ref[:cx, :, :] = up.reshape(cx, th, 4 * w).astype(o_ref.dtype)
    o_ref[cx:, :, :] = y_ref[...]


def _pick_row_block(h, cx, cy, w, itemsize, budget_bytes=2 * 1024 * 1024):
    """Largest TPU-tileable row block TH dividing H whose per-step blocks
    (x + y + out) stay under ~budget_bytes, so grid-step overhead (~0.35 us)
    is amortized while double-buffered blocks fit comfortably in VMEM on
    v5e/v6e/v7x."""
    def blk_bytes(th):
        # x: cx*th*w ; y: cy*th*4w ; out: (cx+cy)*th*4w
        return itemsize * th * w * (cx + 4 * cy + 4 * (cx + cy))
    cands = [d for d in range(1, h + 1)
             if h % d == 0 and (d == h or d % 8 == 0)]
    under = [d for d in cands if blk_bytes(d) <= budget_bytes]
    return max(under) if under else min(cands)


@jax.jit
def cat_upsample(x, y):
    """Equivalent of _cat.forward(x, y) for NCHW inputs."""
    n, cx, h, w = x.shape
    ny, cy, hy, wy = y.shape
    assert n == ny and hy == 2 * h and wy == 2 * w, "y must be (N, Cy, 2H, 2W)"
    assert x.dtype == y.dtype, "x and y must share a dtype"

    th = _pick_row_block(h, cx, cy, w, jnp.dtype(x.dtype).itemsize)
    nr = h // th

    # Row-merged views: bit-identical, free reshapes under jit.
    y_m = y.reshape(n, cy, h, 4 * w)

    # EW[w, q] = 1 iff (q % 2W)//2 == w, so (row @ EW)[q] = row[(q % 2W)//2]:
    # one matmul performs both the W-duplication and the H-duplication in the
    # merged layout.  Built once, kept VMEM-resident via a constant index_map.
    q = jnp.arange(4 * w)
    ew = (jnp.arange(w)[:, None] == ((q % (2 * w)) // 2)[None, :]).astype(x.dtype)

    out_m = pl.pallas_call(
        _cat_kernel,
        out_shape=jax.ShapeDtypeStruct((n, cx + cy, h, 4 * w), x.dtype),
        grid_spec=pltpu.PrefetchScalarGridSpec(
            num_scalar_prefetch=0,
            grid=(n, nr),                                  # (batch, row block)
            in_specs=[
                pl.BlockSpec((w, 4 * w), lambda b, r: (0, 0)),          # EW resident
                pl.BlockSpec((None, cx, th, w), lambda b, r: (b, 0, r, 0)),
                pl.BlockSpec((None, cy, th, 4 * w), lambda b, r: (b, 0, r, 0)),
            ],
            out_specs=pl.BlockSpec((None, cx + cy, th, 4 * w),
                                   lambda b, r: (b, 0, r, 0)),
        ),
        compiler_params=pltpu.CompilerParams(
            dimension_semantics=("parallel", "parallel")),
    )(ew, x, y_m)

    # Free reshape back to the NCHW (2H, 2W) layout.
    return out_m.reshape(n, cx + cy, 2 * h, 2 * w)


if __name__ == "__main__":
    key = jax.random.PRNGKey(0)
    kx, ky = jax.random.split(key)
    # x is NCHW; y matches the upsampled spatial size so the channel concat is valid.
    x = jax.random.normal(kx, (2, 4, 16, 16), dtype=jnp.float32)
    y = jax.random.normal(ky, (2, 4, 32, 32), dtype=jnp.float32)

    out = cat_upsample(x, y)
    out = jax.block_until_ready(out)

    # Reference semantics: nearest 2x upsample (== repeat) then channel concat.
    up_ref = jnp.repeat(jnp.repeat(x, 2, axis=2), 2, axis=3)
    expected = jnp.concatenate([up_ref, y], axis=1)

    assert out.shape == (2, 8, 32, 32), out.shape
    assert out.dtype == expected.dtype
    assert bool(jnp.allclose(out, expected, atol=1e-6)), "mismatch vs reference"
    print("KERNEL_OK")
</pallas_src>

<mosaic_0001>
module attributes {stable_mosaic.version = 11 : i64} {
  func.func @_cat_kernel(%arg0: i32, %arg1: i32, %arg2: memref<16x64xf32, #tpu.memory_space<vmem>>, %arg3: memref<1x4x16x16xf32, #tpu.memory_space<vmem>>, %arg4: memref<1x4x16x64xf32, #tpu.memory_space<vmem>>, %arg5: memref<1x8x16x64xf32, #tpu.memory_space<vmem>>) attributes {dimension_semantics = [#tpu.dimension_semantics<parallel>, #tpu.dimension_semantics<parallel>], iteration_bounds = array<i64: 2, 1>, scalar_prefetch = 0 : i64, scratch_operands = 0 : i64, tpu.core_type = #tpu.core_type<tc>, window_params = [{pipeline_mode = #tpu.pipeline_mode<synchronous>, transform_indices = @transform_0, window_bounds = array<i64: 16, 64>}, {transform_indices = @transform_1, window_bounds = array<i64: 1, 4, 16, 16>}, {transform_indices = @transform_2, window_bounds = array<i64: 1, 4, 16, 64>}, {transform_indices = @transform_3, window_bounds = array<i64: 1, 8, 16, 64>}]} {
    %c0 = arith.constant 0 : index
    %c0_0 = arith.constant 0 : index
    %c0_1 = arith.constant 0 : index
    %c0_2 = arith.constant 0 : index
    %0 = vector.load %arg3[%c0, %c0_0, %c0_1, %c0_2] : memref<1x4x16x16xf32, #tpu.memory_space<vmem>>, vector<1x4x16x16xf32>
    %1 = vector.shape_cast %0 : vector<1x4x16x16xf32> to vector<4x16x16xf32>
    %2 = vector.shape_cast %1 : vector<4x16x16xf32> to vector<64x16xf32>
    %c0_3 = arith.constant 0 : index
    %c0_4 = arith.constant 0 : index
    %3 = vector.load %arg2[%c0_3, %c0_4] : memref<16x64xf32, #tpu.memory_space<vmem>>, vector<16x64xf32>
    %cst = arith.constant dense<0.000000e+00> : vector<64x64xf32>
    %4 = tpu.matmul %2, %3, %cst {dimension_numbers = #tpu.dot_dimension_numbers<[1], [0], [0], [1], [0, 0, 1, 1], [], []>} : vector<64x16xf32>, vector<16x64xf32>, vector<64x64xf32> -> vector<64x64xf32>
    %5 = vector.shape_cast %4 : vector<64x64xf32> to vector<4x16x64xf32>
    %c0_5 = arith.constant 0 : index
    %c0_6 = arith.constant 0 : index
    %c0_7 = arith.constant 0 : index
    %c0_8 = arith.constant 0 : index
    %6 = vector.load %arg5[%c0_5, %c0_6, %c0_7, %c0_8] : memref<1x8x16x64xf32, #tpu.memory_space<vmem>>, vector<1x4x16x64xf32>
    %7 = vector.shape_cast %6 : vector<1x4x16x64xf32> to vector<4x16x64xf32>
    %8 = vector.shape_cast %5 : vector<4x16x64xf32> to vector<1x4x16x64xf32>
    tpu.vector_store %arg5[%c0_5, %c0_6, %c0_7, %c0_8], %8 {strides = array<i32>} : memref<1x8x16x64xf32, #tpu.memory_space<vmem>>, vector<1x4x16x64xf32>,
    %c0_9 = arith.constant 0 : index
    %c0_10 = arith.constant 0 : index
    %c0_11 = arith.constant 0 : index
    %c0_12 = arith.constant 0 : index
    %9 = vector.load %arg4[%c0_9, %c0_10, %c0_11, %c0_12] : memref<1x4x16x64xf32, #tpu.memory_space<vmem>>, vector<1x4x16x64xf32>
    %10 = vector.shape_cast %9 : vector<1x4x16x64xf32> to vector<4x16x64xf32>
    %c0_13 = arith.constant 0 : index
    %c4 = arith.constant 4 : index
    %c0_14 = arith.constant 0 : index
    %c0_15 = arith.constant 0 : index
    %11 = vector.load %arg5[%c0_13, %c4, %c0_14, %c0_15] : memref<1x8x16x64xf32, #tpu.memory_space<vmem>>, vector<1x4x16x64xf32>
    %12 = vector.shape_cast %11 : vector<1x4x16x64xf32> to vector<4x16x64xf32>
    %13 = vector.shape_cast %10 : vector<4x16x64xf32> to vector<1x4x16x64xf32>
    tpu.vector_store %arg5[%c0_13, %c4, %c0_14, %c0_15], %13 {strides = array<i32>} : memref<1x8x16x64xf32, #tpu.memory_space<vmem>>, vector<1x4x16x64xf32>,
    return
  }
  func.func @transform_0(%arg0: i32, %arg1: i32) -> (i32, i32) {
    %c0_i32 = arith.constant 0 : i32
    %c0_i32_0 = arith.constant 0 : i32
    %c0_i32_1 = arith.constant 0 : i32
    return %c0_i32, %c0_i32_0 : i32, i32
  }
  func.func @transform_1(%arg0: i32, %arg1: i32) -> (i32, i32, i32, i32) {
    %c0_i32 = arith.constant 0 : i32
    %c0_i32_0 = arith.constant 0 : i32
    %c0_i32_1 = arith.constant 0 : i32
    return %arg0, %c0_i32, %arg1, %c0_i32_0 : i32, i32, i32, i32
  }
  func.func @transform_2(%arg0: i32, %arg1: i32) -> (i32, i32, i32, i32) {
    %c0_i32 = arith.constant 0 : i32
    %c0_i32_0 = arith.constant 0 : i32
    %c0_i32_1 = arith.constant 0 : i32
    return %arg0, %c0_i32, %arg1, %c0_i32_0 : i32, i32, i32, i32
  }
  func.func @transform_3(%arg0: i32, %arg1: i32) -> (i32, i32, i32, i32) {
    %c0_i32 = arith.constant 0 : i32
    %c0_i32_0 = arith.constant 0 : i32
    %c0_i32_1 = arith.constant 0 : i32
    return %arg0, %c0_i32, %arg1, %c0_i32_0 : i32, i32, i32, i32
  }
}

</mosaic_0001>

<bundles_post_ra>
// kernel: cat_upsample.1
= control target key start
LH: loop header
LB: loop body
LE: loop exit
PB: predicated region body
PF: predicated region fallthrough
CT: control target
= control target key end

     0   :  { %s649_s12 = smov 0   ;;  %s651_s13 = smov 0   ;;  %s743_s0 = inlined_call_operand.vmem [shape: f32[16,64], index: 0, kind: input, shape index: {}]   ;;  %s744_s1 = inlined_call_operand.vmem [shape: f32[2,4,16,16], index: 1, kind: input, shape index: {}]   ;;  %s745_s2 = inlined_call_operand.vmem [shape: f32[2,4,16,64], index: 2, kind: input, shape index: {}]   ;;  %s746_s3 = inlined_call_operand.vmem [shape: f32[2,8,16,64], index: 3, kind: output, shape index: {}]  }
   0x1   :  { %s653_s14 = smov 0  }
   0x2 LB: > { %s25_s15 = sadd.s32 1, %s623_s13  ;;  %p521_p0 = scmp.ge.s32.totalorder %s627_s14, 1  ;;  %s627_s14 = sphi %s653_s14, %s13_s14   ;;  %s623_s13 = sphi %s651_s13, %s748_s13   ;;  %s619_s12 = sphi %s649_s12, %s747_s12  }
   0x3   : > { %p27_p1 = scmp.ge.s32.totalorder %s25_s15, 2  ;;  %p175_p2 = scmp.lt.s32.totalorder %s627_s14, 3 }
   0x5   : > { %s750_s15 = smov (%p27_p1, %s25_s15), 0  ;;  %p176_p3 = pnand %p521_p0, %p175_p2 }
   0x6   : > { %v254_v0 = vld [vmem:[%s743_s0] sm:$0xff] (!%p176_p3)  ;;  %v255_v1 = vld [vmem:[%s743_s0 + $0x8] sm:$0xff] (!%p176_p3)  ;;  %p217_p4 = scmp.lt.s32.totalorder (!%p176_p3), %s619_s12, 1  ;;  %vm256_vm0 = vcmask (!%p176_p3), 130048   ;;  %vm386_vm1 = vcmask (!%p176_p3), 523264  }
   0x7   : > { %179 = sbr.rel (%p176_p3) target bundleno = 240 (0xf0), region = 32  ;;  %v575_v2 = vpack.c.bf16 (!%p176_p3), %v255_v1, %v254_v0 }
   0x9   : > { %576 = vmatprep.subr.bf16.mxu0 (!%p176_p3), %v575_v2  ;;  %579 = vmatprep.subr.bf16.mxu1 (!%p176_p3), %v575_v2 }
   0xa   : > { %578 = vmatpush3.bf16.msra.mxu0 (!%p176_p3), %v575_v2  ;;  %580 = vmatpush3.bf16.msra.mxu1 (!%p176_p3), %v575_v2 }
   0xe   : > { %s752_s12 = smov (!%p217_p4, %s619_s12), 1 }
   0xf   : > { %s546_s20 = sshll.u32 %s752_s12, 6  ;;  %s548_s21 = sshll.u32 %s752_s12, 7 }
  0x10   : > { %s676_s24 = scalar_lea.vmem %s744_s1, %s546_s20  ;;  %s234_s27 = scalar_lea.vmem %s745_s2, %s546_s20 }
  0x11   : > { %s684_s30 = scalar_lea.vmem %s746_s3, %s548_s21  ;;  %v246_v3 = vld [vmem:[%s676_s24] sm:$0xff]  ;;  %v396_v5 = vld [vmem:[%s234_s27 + $0x8] sm:$0xff]  ;;  %v397_v6 = vld [vmem:[%s234_s27 + $0x10] sm:$0xff] }
  0x12   : > { %v395_v4 = vld [vmem:[%s234_s27] sm:$0xff]  ;;  %563 = vmatprep.mubr.msk.f32.mxu0 %vm256_vm0, %v246_v3  ;;  %v398_v7 = vld [vmem:[%s234_s27 + $0x18] sm:$0xff]  ;;  %537 = vst.msk [vmem:[%s684_s30 + $0x48] sm:$0xff] %vm386_vm1, %v396_v5  ;;  %v400_v9 = vld [vmem:[%s234_s27 + $0x28] sm:$0xff] }
  0x13   : > { %v399_v8 = vld [vmem:[%s234_s27 + $0x20] sm:$0xff]  ;;  %536 = vst.msk [vmem:[%s684_s30 + $0x40] sm:$0xff] %vm386_vm1, %v395_v4  ;;  %v401_v10 = vld [vmem:[%s234_s27 + $0x30] sm:$0xff]  ;;  %v402_v11 = vld [vmem:[%s234_s27 + $0x38] sm:$0xff] }
  0x14   : > { %538 = vst.msk [vmem:[%s684_s30 + $0x50] sm:$0xff] %vm386_vm1, %v397_v6  ;;  %539 = vst.msk [vmem:[%s684_s30 + $0x58] sm:$0xff] %vm386_vm1, %v398_v7  ;;  %v250_v12 = vld [vmem:[%s676_s24 + $0x20] sm:$0xff]  ;;  %v247_v13 = vld [vmem:[%s676_s24 + $0x8] sm:$0xff] }
  0x15   : > { %540 = vst.msk [vmem:[%s684_s30 + $0x60] sm:$0xff] %vm386_vm1, %v399_v8  ;;  %541 = vst.msk [vmem:[%s684_s30 + $0x68] sm:$0xff] %vm386_vm1, %v400_v9  ;;  %v251_v14 = vld [vmem:[%s676_s24 + $0x28] sm:$0xff]  ;;  %569 = vmatprep.mubr.msk.f32.mxu1 %vm256_vm0, %v250_v12  ;;  %564 = vmatmul.mubr.msk.f32.vlgmr.msra.gmra.mrb[0].mxu0 %vm256_vm0, %v247_v13  ;;  %v248_v15 = vld [vmem:[%s676_s24 + $0x10] sm:$0xff] }
  0x16   : > { %542 = vst.msk [vmem:[%s684_s30 + $0x70] sm:$0xff] %vm386_vm1, %v401_v10  ;;  %543 = vst.msk [vmem:[%s684_s30 + $0x78] sm:$0xff] %vm386_vm1, %v402_v11  ;;  %v252_v16 = vld [vmem:[%s676_s24 + $0x30] sm:$0xff]  ;;  %570 = vmatmul.mubr.msk.f32.vlgmr.msra.gmra.mrb[0].mxu1 %vm256_vm0, %v251_v14  ;;  %566 = vmatprep.mubr.msk.f32.mxu0 %vm256_vm0, %v248_v15  ;;  %v249_v17 = vld [vmem:[%s676_s24 + $0x18] sm:$0xff] }
  0x17   : > { %572 = vmatprep.mubr.msk.f32.mxu1 %vm256_vm0, %v252_v16  ;;  %v253_v18 = vld [vmem:[%s676_s24 + $0x38] sm:$0xff] }
  0x19   : > { %567 = vmatmul.mubr.msk.f32.gmra.mrb[2].mxu0 %vm256_vm0, %v249_v17 }
  0x1a   : > { %573 = vmatmul.mubr.msk.f32.gmra.mrb[2].mxu1 %vm256_vm0, %v253_v18 }
  0xe8   : > { %v565_v19 = vpop.f32.mrb[0].mxu0 }
  0xe9   : > { %388 = vst.msk [vmem:[%s684_s30 + $0x8] sm:$0xff] %vm386_vm1, %v565_v19  ;;  %v571_v20 = vpop.f32.mrb[0].mxu1  ;;  %v347_v21 = vpop.f32.mrb[1].mxu0 }
  0xea   : > { %392 = vst.msk [vmem:[%s684_s30 + $0x28] sm:$0xff] %vm386_vm1, %v571_v20  ;;  %387 = vst.msk [vmem:[%s684_s30] sm:$0xff] %vm386_vm1, %v347_v21  ;;  %v367_v22 = vpop.f32.mrb[1].mxu1 }
  0xeb   : > { %391 = vst.msk [vmem:[%s684_s30 + $0x20] sm:$0xff] %vm386_vm1, %v367_v22 }
  0xec   : > { %v568_v23 = vpop.f32.mrb[2].mxu0 }
  0xed   : > { %390 = vst.msk [vmem:[%s684_s30 + $0x18] sm:$0xff] %vm386_vm1, %v568_v23  ;;  %v574_v24 = vpop.f32.mrb[2].mxu1  ;;  %v357_v25 = vpop.f32.mrb[3].mxu0 }
  0xee   : > { %394 = vst.msk [vmem:[%s684_s30 + $0x38] sm:$0xff] %vm386_vm1, %v574_v24  ;;  %389 = vst.msk [vmem:[%s684_s30 + $0x10] sm:$0xff] %vm386_vm1, %v357_v25  ;;  %v377_v26 = vpop.f32.mrb[3].mxu1 }
  0xef   : > { %393 = vst.msk [vmem:[%s684_s30 + $0x30] sm:$0xff] %vm386_vm1, %v377_v26 }
  0xf0 PF: > { %s13_s14 = sadd.s32 1, %s627_s14   ;;  %s747_s12 = smov %s623_s13 }
  0xf1   : > { %p10_p5 = scmp.ge.s32.totalorder %s13_s14, 4   ;;  %s748_s13 = smov %s750_s15 }
  0xf3   :  { %12 = sbr.rel (!%p10_p5) target bundleno = 2 (0x2), region = 66 }

</bundles_post_ra>
